<compile_context>
chip_gen: v5e
topology: v5e:2x2
jax: 0.10.0
libtpu: 0.0.40
codegen_flags: <defaults>
</compile_context>

<pallas_src>
import functools

import jax
import jax.numpy as jnp
from jax import lax
from jax.experimental import pallas as pl
from jax.experimental.pallas import tpu as pltpu


def _sdpa_kernel(q_ref, k_ref, v_ref, out_ref, *attn_refs, inv_temperature, use_softmax):
    # One grid step = one batch element x one Lq tile (blocks carry a leading size-1 batch dim).
    # Scale Q (a (TQ, D) tile) instead of the (TQ, Lk) score matrix: Lk/D x fewer VALU ops.
    q = q_ref[0] * inv_temperature  # (TQ, D)
    k = k_ref[0]                    # (Lk, D)
    v = v_ref[0]                    # (Lk, D)

    # s = (q / temperature) @ k^T — contract on the last (lane-minor) dim of both operands,
    # no explicit transpose / XLU relayout, f32 accumulation on the MXU.
    s = lax.dot_general(
        q, k,
        dimension_numbers=(((1,), (1,)), ((), ())),
        preferred_element_type=jnp.float32,
    )  # (TQ, Lk) f32

    if use_softmax:
        # Numerically stable softmax over the key axis (torch Softmax(dim=2)), math kept in f32.
        m = jnp.max(s, axis=-1, keepdims=True)
        p = jnp.exp(s - m)
        denom = jnp.sum(p, axis=-1, keepdims=True)
        # Exact reciprocal: only (TQ, 1) values, so the approx path saves nothing and exactness
        # keeps softmax rows summing to 1 (parity with PyTorch).
        attn = p * pl.reciprocal(denom)
    else:
        attn = jax.nn.sigmoid(s)  # attn_type='sigmoid' branch of the module

    # dropout: identity (inference / eval mode)

    # Single cast sweep over the (TQ, Lk) tile; reused for the second matmul and the writeback.
    attn_lowp = attn.astype(v.dtype)
    out = jnp.dot(attn_lowp, v, preferred_element_type=jnp.float32)  # (TQ, D)

    out_ref[0] = out.astype(out_ref.dtype)
    if attn_refs:
        attn_refs[0][0] = attn_lowp.astype(attn_refs[0].dtype)


def _vmem_capacity_bytes():
    """Physical per-core VMEM; conservative (v7x-sized) default if the query is unavailable."""
    try:
        return int(getattr(pltpu.get_tpu_info(), "vmem_capacity_bytes"))
    except Exception:
        return 64 << 20


def _vmem_budget_bytes(capacity):
    """Tile-picking budget: most of VMEM on v5e/v6e (128 MiB), ~40 MiB on v7x (64 MiB)."""
    if capacity >= (128 << 20):
        return 88 << 20
    return max(capacity - (24 << 20), 16 << 20)


def _footprint_bytes(tq, lk, d, in_itemsize, attn_itemsize, with_attn, kv_buffer_count):
    """Estimated per-step VMEM footprint, including the in-body f32 temporaries."""
    q_out = 2 * 2 * tq * d * in_itemsize                        # q + out tiles, double-buffered
    kv = kv_buffer_count * 2 * lk * d * in_itemsize             # k + v blocks
    attn = (2 * tq * lk * attn_itemsize) if with_attn else 0    # attn tile, double-buffered
    temps = 2 * tq * lk * 4                                     # s and p live (TQ, Lk) f32 arrays
    return q_out + kv + attn + temps


def _sublane_multiple(itemsize):
    # Sub-32-bit dtypes pack along sublanes: min second-minor tile is 8 (f32), 16 (bf16), 32 (i8/fp8).
    return max(8, 32 // max(int(itemsize), 1))


def _pick_q_tile(lq, lk, d, in_itemsize, attn_itemsize, with_attn, kv_buffer_count, budget):
    """Largest Lq tile that divides Lq, respects dtype/MXU tiling, and fits the VMEM budget."""
    sub = _sublane_multiple(in_itemsize)

    def fits(t):
        return _footprint_bytes(t, lk, d, in_itemsize, attn_itemsize,
                                with_attn, kv_buffer_count) <= budget

    # Preferred: MXU-friendly power-of-two tiles (large M keeps the vmatmul cadence full).
    cands = [t for t in (512, 256, 128, 64, 32, 16, 8) if t % sub == 0 and lq % t == 0]
    if not cands:
        # Fallback: any divisor of Lq that is a multiple of 8 (legal second-minor block size).
        cands = sorted((t for t in range(8, lq + 1, 8) if lq % t == 0), reverse=True)
    for t in cands:
        if fits(t):
            return t
    if cands:
        return cands[-1]  # best effort: smallest legal tile even if over budget
    return lq             # Lq has no multiple-of-8 divisor: full-axis block is always legal


def scaled_dot_product_attention(q, k, v, temperature, *, attn_type="softmax",
                                 return_attn=True, attn_dtype=None, kv_buffer_count=2):
    """q: (B, Lq, D), k/v: (B, Lk, D) -> (output (B, Lq, D), attn (B, Lq, Lk)) or output only."""
    B, Lq, D = q.shape
    _, Lk, _ = k.shape
    assert k.shape == (B, Lk, D) and v.shape == (B, Lk, D)
    assert attn_type in ("softmax", "sigmoid")

    if attn_dtype is None:
        attn_dtype = q.dtype  # follow input dtype (halves the attn writeback for bf16 inputs)

    in_itemsize = jnp.dtype(q.dtype).itemsize
    attn_itemsize = jnp.dtype(attn_dtype).itemsize

    capacity = _vmem_capacity_bytes()
    budget = _vmem_budget_bytes(capacity)
    tq = _pick_q_tile(Lq, Lk, D, in_itemsize, attn_itemsize, return_attn,
                      kv_buffer_count, budget)
    grid = (B, pl.cdiv(Lq, tq))  # tq divides Lq (or equals it) by construction

    kernel = functools.partial(
        _sdpa_kernel,
        inv_temperature=1.0 / float(temperature),
        use_softmax=(attn_type == "softmax"),
    )

    # K/V index_maps are constant along the Lq-tile axis, so they are only re-fetched at batch
    # boundaries; kv_buffer_count=1 single-buffers them to reclaim Lk*D*itemsize of VMEM (v7x).
    kv_kwargs = {} if kv_buffer_count == 2 else {"pipeline_mode": pl.Buffered(kv_buffer_count)}

    in_specs = [
        pl.BlockSpec((1, tq, D), lambda b, i: (b, i, 0)),               # q: Lq-tiled
        pl.BlockSpec((1, Lk, D), lambda b, i: (b, 0, 0), **kv_kwargs),  # k: full keys
        pl.BlockSpec((1, Lk, D), lambda b, i: (b, 0, 0), **kv_kwargs),  # v: full values
    ]

    out_spec_o = pl.BlockSpec((1, tq, D), lambda b, i: (b, i, 0))
    if return_attn:
        out_shape = (
            jax.ShapeDtypeStruct((B, Lq, D), q.dtype),      # output
            jax.ShapeDtypeStruct((B, Lq, Lk), attn_dtype),  # attention weights
        )
        out_specs = [out_spec_o,
                     pl.BlockSpec((1, tq, Lk), lambda b, i: (b, i, 0))]  # lane-dense attn tile
    else:
        out_shape = jax.ShapeDtypeStruct((B, Lq, D), q.dtype)
        out_specs = out_spec_o

    # Scoped-VMEM limit: footprint + headroom, never above physical capacity.
    footprint = _footprint_bytes(tq, Lk, D, in_itemsize, attn_itemsize,
                                 return_attn, kv_buffer_count)
    vmem_limit = int(min(max(footprint + (8 << 20), 32 << 20), capacity - (8 << 20)))

    # Advisory cost estimate: two (Lq x Lk x D) matmuls + exp over the score matrix.
    attn_bytes = B * Lq * Lk * attn_itemsize if return_attn else 0
    cost = pl.CostEstimate(
        flops=2 * 2 * B * Lq * Lk * D,
        transcendentals=B * Lq * Lk,
        bytes_accessed=(q.size + k.size + v.size + B * Lq * D) * in_itemsize + attn_bytes,
    )

    return pl.pallas_call(
        kernel,
        out_shape=out_shape,
        grid_spec=pltpu.PrefetchScalarGridSpec(
            num_scalar_prefetch=0,
            grid=grid,
            in_specs=in_specs,
            out_specs=out_specs,
        ),
        compiler_params=pltpu.CompilerParams(
            dimension_semantics=("parallel", "parallel"),
            vmem_limit_bytes=vmem_limit,
        ),
        cost_estimate=cost,
    )(q, k, v)


def _reference(q, k, v, temperature):
    attn = jnp.einsum("bqd,bkd->bqk", q, k) / temperature
    attn = jax.nn.softmax(attn, axis=2)
    out = jnp.einsum("bqk,bkd->bqd", attn, v)
    return out, attn


if __name__ == "__main__":
    B, Lq, Lk, D = 2, 8, 16, 32
    temperature = float(D) ** 0.5

    key = jax.random.PRNGKey(0)
    kq, kk, kv = jax.random.split(key, 3)
    q = jax.random.normal(kq, (B, Lq, D), dtype=jnp.float32)
    k = jax.random.normal(kk, (B, Lk, D), dtype=jnp.float32)
    v = jax.random.normal(kv, (B, Lk, D), dtype=jnp.float32)

    ref_out, ref_attn = _reference(q, k, v, temperature)

    # Default path: softmax attention, both outputs (matches the PyTorch forward).
    out, attn = scaled_dot_product_attention(q, k, v, temperature)
    jax.block_until_ready((out, attn))
    assert jnp.allclose(out, ref_out, atol=1e-5, rtol=1e-5), "output mismatch"
    assert jnp.allclose(attn, ref_attn, atol=1e-5, rtol=1e-5), "attn mismatch"

    # No-attn variant: skips the B*Lq*Lk HBM writeback (the dominant byte stream).
    out_only = scaled_dot_product_attention(q, k, v, temperature, return_attn=False)
    jax.block_until_ready(out_only)
    assert jnp.allclose(out_only, ref_out, atol=1e-5, rtol=1e-5), "no-attn output mismatch"

    print("KERNEL_OK")
</pallas_src>

<mosaic_0001>
module attributes {stable_mosaic.version = 11 : i64} {
  func.func @_sdpa_kernel(%arg0: i32, %arg1: i32, %arg2: memref<1x8x32xf32, #tpu.memory_space<vmem>>, %arg3: memref<1x16x32xf32, #tpu.memory_space<vmem>>, %arg4: memref<1x16x32xf32, #tpu.memory_space<vmem>>, %arg5: memref<1x8x32xf32, #tpu.memory_space<vmem>>, %arg6: memref<1x8x16xf32, #tpu.memory_space<vmem>>) attributes {dimension_semantics = [#tpu.dimension_semantics<parallel>, #tpu.dimension_semantics<parallel>], iteration_bounds = array<i64: 2, 1>, scalar_prefetch = 0 : i64, scratch_operands = 0 : i64, tpu.core_type = #tpu.core_type<tc>, window_params = [{transform_indices = @transform_0, window_bounds = array<i64: 1, 8, 32>}, {transform_indices = @transform_1, window_bounds = array<i64: 1, 16, 32>}, {transform_indices = @transform_2, window_bounds = array<i64: 1, 16, 32>}, {transform_indices = @transform_3, window_bounds = array<i64: 1, 8, 32>}, {transform_indices = @transform_4, window_bounds = array<i64: 1, 8, 16>}]} {
    %c0 = arith.constant 0 : index
    %c0_0 = arith.constant 0 : index
    %c0_1 = arith.constant 0 : index
    %0 = vector.load %arg2[%c0, %c0_0, %c0_1] : memref<1x8x32xf32, #tpu.memory_space<vmem>>, vector<1x8x32xf32>
    %1 = vector.shape_cast %0 : vector<1x8x32xf32> to vector<8x32xf32>
    %cst = arith.constant 0.176776692 : f32
    %2 = vector.broadcast %cst : f32 to vector<8x32xf32>
    %3 = arith.mulf %1, %2 : vector<8x32xf32>
    %c0_2 = arith.constant 0 : index
    %c0_3 = arith.constant 0 : index
    %c0_4 = arith.constant 0 : index
    %4 = vector.load %arg3[%c0_2, %c0_3, %c0_4] : memref<1x16x32xf32, #tpu.memory_space<vmem>>, vector<1x16x32xf32>
    %5 = vector.shape_cast %4 : vector<1x16x32xf32> to vector<16x32xf32>
    %c0_5 = arith.constant 0 : index
    %c0_6 = arith.constant 0 : index
    %c0_7 = arith.constant 0 : index
    %6 = vector.load %arg4[%c0_5, %c0_6, %c0_7] : memref<1x16x32xf32, #tpu.memory_space<vmem>>, vector<1x16x32xf32>
    %7 = vector.shape_cast %6 : vector<1x16x32xf32> to vector<16x32xf32>
    %cst_8 = arith.constant dense<0.000000e+00> : vector<8x16xf32>
    %8 = tpu.matmul %3, %5, %cst_8 {dimension_numbers = #tpu.dot_dimension_numbers<[1], [1], [0], [0], [0, 0, 1, 0], [], []>} : vector<8x32xf32>, vector<16x32xf32>, vector<8x16xf32> -> vector<8x16xf32>
    %cst_9 = arith.constant dense<0xFF800000> : vector<8xf32>
    %9 = vector.multi_reduction <maximumf>, %8, %cst_9 [1] : vector<8x16xf32> to vector<8xf32>
    %10 = vector.shape_cast %9 : vector<8xf32> to vector<8x1xf32>
    %11 = vector.broadcast %10 : vector<8x1xf32> to vector<8x16xf32>
    %12 = arith.subf %8, %11 : vector<8x16xf32>
    %13 = math.exp %12 : vector<8x16xf32>
    %cst_10 = arith.constant dense<0.000000e+00> : vector<8xf32>
    %14 = vector.multi_reduction <add>, %13, %cst_10 [1] : vector<8x16xf32> to vector<8xf32>
    %15 = vector.shape_cast %14 : vector<8xf32> to vector<8x1xf32>
    %16 = tpu.reciprocal %15 : vector<8x1xf32> -> vector<8x1xf32>
    %17 = vector.broadcast %16 : vector<8x1xf32> to vector<8x16xf32>
    %18 = arith.mulf %13, %17 : vector<8x16xf32>
    %cst_11 = arith.constant dense<0.000000e+00> : vector<8x32xf32>
    %19 = tpu.matmul %18, %7, %cst_11 {dimension_numbers = #tpu.dot_dimension_numbers<[1], [0], [0], [1], [0, 0, 1, 1], [], []>} : vector<8x16xf32>, vector<16x32xf32>, vector<8x32xf32> -> vector<8x32xf32>
    %c0_12 = arith.constant 0 : index
    %c0_13 = arith.constant 0 : index
    %c0_14 = arith.constant 0 : index
    %20 = vector.load %arg5[%c0_12, %c0_13, %c0_14] : memref<1x8x32xf32, #tpu.memory_space<vmem>>, vector<1x8x32xf32>
    %21 = vector.shape_cast %20 : vector<1x8x32xf32> to vector<8x32xf32>
    %22 = vector.shape_cast %19 : vector<8x32xf32> to vector<1x8x32xf32>
    tpu.vector_store %arg5[%c0_12, %c0_13, %c0_14], %22 {strides = array<i32>} : memref<1x8x32xf32, #tpu.memory_space<vmem>>, vector<1x8x32xf32>,
    %c0_15 = arith.constant 0 : index
    %c0_16 = arith.constant 0 : index
    %c0_17 = arith.constant 0 : index
    %23 = vector.load %arg6[%c0_15, %c0_16, %c0_17] : memref<1x8x16xf32, #tpu.memory_space<vmem>>, vector<1x8x16xf32>
    %24 = vector.shape_cast %23 : vector<1x8x16xf32> to vector<8x16xf32>
    %25 = vector.shape_cast %18 : vector<8x16xf32> to vector<1x8x16xf32>
    tpu.vector_store %arg6[%c0_15, %c0_16, %c0_17], %25 {strides = array<i32>} : memref<1x8x16xf32, #tpu.memory_space<vmem>>, vector<1x8x16xf32>,
    return
  }
  func.func @transform_0(%arg0: i32, %arg1: i32) -> (i32, i32, i32) {
    %c0_i32 = arith.constant 0 : i32
    %c0_i32_0 = arith.constant 0 : i32
    return %arg0, %arg1, %c0_i32 : i32, i32, i32
  }
  func.func @transform_1(%arg0: i32, %arg1: i32) -> (i32, i32, i32) {
    %c0_i32 = arith.constant 0 : i32
    %c0_i32_0 = arith.constant 0 : i32
    %c0_i32_1 = arith.constant 0 : i32
    return %arg0, %c0_i32, %c0_i32_0 : i32, i32, i32
  }
  func.func @transform_2(%arg0: i32, %arg1: i32) -> (i32, i32, i32) {
    %c0_i32 = arith.constant 0 : i32
    %c0_i32_0 = arith.constant 0 : i32
    %c0_i32_1 = arith.constant 0 : i32
    return %arg0, %c0_i32, %c0_i32_0 : i32, i32, i32
  }
  func.func @transform_3(%arg0: i32, %arg1: i32) -> (i32, i32, i32) {
    %c0_i32 = arith.constant 0 : i32
    %c0_i32_0 = arith.constant 0 : i32
    return %arg0, %arg1, %c0_i32 : i32, i32, i32
  }
  func.func @transform_4(%arg0: i32, %arg1: i32) -> (i32, i32, i32) {
    %c0_i32 = arith.constant 0 : i32
    %c0_i32_0 = arith.constant 0 : i32
    return %arg0, %arg1, %c0_i32 : i32, i32, i32
  }
}

</mosaic_0001>

<bundles_post_ra>
// kernel: tpu_custom_call.1
= control target key start
LH: loop header
LB: loop body
LE: loop exit
PB: predicated region body
PF: predicated region fallthrough
CT: control target
= control target key end

     0   :  { %s1136_s0 = inlined_call_operand.hbm [shape: f32[2,8,32], index: 0, kind: input, shape index: {}]   ;;  %s1137_s1 = inlined_call_operand.hbm [shape: f32[2,16,32], index: 1, kind: input, shape index: {}]   ;;  %s1138_s2 = inlined_call_operand.hbm [shape: f32[2,16,32], index: 2, kind: input, shape index: {}]   ;;  %s1139_s3 = inlined_call_operand.hbm [shape: f32[2,8,32], index: 3, kind: output, shape index: {0}]   ;;  %s1140_s4 = inlined_call_operand.hbm [shape: f32[2,8,16], index: 4, kind: output, shape index: {1}]  }
   0x1   :  { %1144 = sst [smem:[#allocation19_spill]] %s1137_s1 }
   0x2   :  { %10 = vsyncpa [#allocation3], 0 }
   0x3   :  { %12 = vsyncpa [#allocation3 + $0x1], 0 }
   0x4   :  { %13 = vsyncpa [#allocation6], 0 }
   0x5   :  { %15 = vsyncpa [#allocation6 + $0x1], 0 }
   0x6   :  { %16 = vsyncpa [#allocation4], 0 }
   0x7   :  { %18 = vsyncpa [#allocation4 + $0x1], 0 }
   0x8   :  { %19 = vsyncpa [#allocation10], 0 }
   0x9   :  { %21 = vsyncpa [#allocation10 + $0x1], 0  ;;  %s956_s15 = smov 0   ;;  %s958_s16 = smov 0  }
   0xa   :  { %s960_s17 = smov 0   ;;  %s962_s18 = smov 0  }
   0xb   :  { %s964_s19 = smov 0   ;;  %s966_s20 = smov 0  }
   0xc LB: > { %1145 = sst [smem:[#allocation15_spill]] %s915_s17  ;;  %s987_s21 = sadd.s32 4294967295, %s927_s20   ;;  %s927_s20 = sphi %s966_s20, %s27_s20   ;;  %s923_s19 = sphi %s964_s19, %s1162_s19   ;;  %s919_s18 = sphi %s962_s18, %s1161_s18   ;;  %s915_s17 = sphi %s960_s17, %s1157_s17   ;;  %s911_s16 = sphi %s958_s16, %s1160_s16   ;;  %s907_s15 = sphi %s956_s15, %s1159_s15  }
   0xd   : > { %s607_s22 = sadd.s32 4294967294, %s927_s20   ;;  %s39_s23 = sadd.s32 1, %s923_s19 }
   0xe   : > { %s48_s24 = sadd.s32 1, %s915_s17  ;;  %p41_p0 = scmp.ge.s32.totalorder %s39_s23, 2 }
   0xf   : > { %p55_p1 = scmp.ne.s32.totalorder %s915_s17, %s911_s16  ;;  %p56_p2 = scmp.eq.s32.totalorder %s927_s20, 0 }
  0x10   : > { %p61_p3 = scmp.ne.s32.totalorder %s911_s16, %s907_s15  ;;  %s1164_s23 = smov (%p41_p0, %s39_s23), 0 }
  0x11   : > { %1146 = sst [smem:[#allocation16_spill]] %s1164_s23  ;;  %p999_p4 = por %p56_p2, %p55_p1 }
  0x12   : > { %p62_p5 = scmp.eq.s32.totalorder %s987_s21, 0  ;;  %s43_s26 = ssub.s32 %s923_s19, %s1164_s23 }
  0x13   : > { %p139_p6 = scmp.eq.s32.totalorder %s987_s21, 1  ;;  %p46_p7 = scmp.eq.s32.totalorder %s43_s26, 0 }
  0x14   : > { %p1007_p8 = por %p62_p5, %p61_p3  ;;  %p145_p10 = scmp.eq.s32.totalorder %s607_s22, 1 }
  0x15   : > { %p1011_p9 = por %p139_p6, %p55_p1  ;;  %p609_p12 = scmp.ge.s32.totalorder %s927_s20, 2 }
  0x16   : > { %s1016_s29 = scalar_select %p46_p7, %s915_s17, %s48_s24  }
  0x17   : > { %p1018_p11 = por %p145_p10, %p61_p3  ;;  %p663_p13 = scmp.lt.s32.totalorder %s927_s20, 2 }
  0x18   : > { %1150 = sst [smem:[#allocation17_spill]] %s1016_s29  ;;  %s1025_s5 = sand.u32 1, %s915_s17  }
  0x19   : > { %s1151_s30 = scalar_select %p1018_p11, 1, 0 }
  0x1a   : > { %s213_s6 = sand.u32 1, %s927_s20   ;;  %s612_s7 = sshll.u32 %s1025_s5, 4 }
  0x1b   : > { %1152 = sst [smem:[#allocation18_spill]] %s1151_s30  ;;  %p1031_p0 = pnand %p663_p13, %p999_p4 }
  0x1c   : > { %s634_s9 = sshll.u32 %s923_s19, 4  ;;  %s1154_s1 = sld [smem:[#allocation19_spill]] }
  0x1d   : > { %s217_s14 = scalar_lea.vmem [#allocation5], %s612_s7  ;;  %s214_s24 = scalar_lea.sflag [#allocation6], %s213_s6 }
  0x1e   : > { %s225_s22 = sshll.u32 %s217_s14, 4  ;;  %s929_s25 = smov 128   ;;  %s226_s22 = int_to_ptr.vmem [resolvable:$true] %s225_s22 }
  0x1f   : > { %s930_s26 = smov 8   ;;  %s244_s17 = scalar_lea.hbm %s1138_s2, %s634_s9 }
  0x20   : > { %s245_s10 = sshll.u32 %s244_s17, 4  ;;  %s239_s11 = scalar_lea.vmem [#allocation7], %s612_s7  ;;  %s246_s10 = int_to_ptr.hbm [resolvable:$true] %s245_s10 }
  0x21   : > { %p618_p1 = scmp.ge.s32.totalorder %s927_s20, 1  ;;  %p255_p2 = scmp.lt.s32.totalorder %s927_s20, 3 }
  0x22   : > { %s222_s12 = scalar_lea.hbm %s1154_s1, %s634_s9  ;;  %s610_s6 = sshll.u32 %s1025_s5, 3 }
  0x23   : > { %s223_s13 = sshll.u32 %s222_s12, 4  ;;  %s247_s12 = sshll.u32 %s239_s11, 4  ;;  %s224_s13 = int_to_ptr.hbm [resolvable:$true] %s223_s13  ;;  %s248_s12 = int_to_ptr.vmem [resolvable:$true] %s247_s12 }
  0x24   : > { %652 = dma.hbm_to_vmem [thread:$0]  (!%p1031_p0), %s224_s13, 256, %s226_s22, %s214_s24, %s929_s25, %s929_s25, %s930_s26  }
  0x25   : > { %p256_p3 = pnand %p618_p1, %p255_p2  ;;  %s611_s14 = sshll.u32 %s923_s19, 3 }
  0x26   : > { %s202_s13 = scalar_lea.hbm %s1136_s0, %s611_s14  ;;  %s197_s23 = scalar_lea.vmem [#allocation2], %s610_s6 }
  0x27   : > { %s204_s22 = sshll.u32 %s202_s13, 4  ;;  %s206_s29 = sshll.u32 %s197_s23, 4  ;;  %s205_s22 = int_to_ptr.hbm [resolvable:$true] %s204_s22  ;;  %s207_s29 = int_to_ptr.vmem [resolvable:$true] %s206_s29 }
  0x28   : > { %s194_s17 = scalar_lea.sflag [#allocation3], %s1025_s5  ;;  %259 = sbr.rel (%p256_p3) target bundleno = 577 (0x241), region = 32 }
  0x29   : > { %649 = dma.hbm_to_vmem [thread:$0]  (!%p1031_p0), %s205_s22, 128, %s207_s29, %s194_s17  }
  0x2a   : > { %655 = dma.hbm_to_vmem [thread:$0]  (!%p1031_p0), %s246_s10, 256, %s248_s12, %s214_s24, %s929_s25, %s929_s25, %s930_s26  }
  0x2b   : > { %s1057_s7 = sand.u32 (!%p256_p3), 1, %s911_s16  }
  0x2c   : > { %s1060_s9 = sshll.u32 (!%p256_p3), %s1057_s7, 3  ;;  %s262_s1 = scalar_lea.sflag (!%p256_p3), [#allocation3], %s1057_s7 }
  0x2d   : > { %s265_s30 = scalar_lea.vmem [#allocation2], %s1060_s9 }
  0x2e   : > { %890 = dma.done.wait (%p1007_p8), %s262_s1, 128  }
  0x2f   : > { %892 = vsyncadd (%p1007_p8), %s262_s1, 4294967168  ;;  %s271_s5 = sand.u32 1, %s987_s21   ;;  %s620_s8 = sshll.u32 %s1057_s7, 4 }
  0x30   : > { %s272_s24 = scalar_lea.sflag [#allocation6], %s271_s5  ;;  %s275_s25 = scalar_lea.vmem [#allocation5], %s620_s8 }
  0x31   : > { %894 = dma.done.wait (%p1007_p8), %s272_s24, 512  }
  0x32   : > { %896 = vsyncadd (%p1007_p8), %s272_s24, 4294966784  ;;  %vm332_vm0 = vcmask 261120   ;;  %v329_v0 = vld [vmem:[%s275_s25 + $0x8] sm:$0xff]  ;;  %v328_v2 = vld [vmem:[%s275_s25] sm:$0xff]  ;;  %vm362_vm1 = vcmask 130048   ;;  %s285_s21 = scalar_lea.vmem [#allocation7], %s620_s8 }
  0x33   : > { %624 = vmatpush.xpose.msk.msra.mxu0 %vm332_vm0, %v329_v0  ;;  %v326_v1 = vld [vmem:[%s265_s30] sm:$0xff]  ;;  %v330_v12 = vld [vmem:[%s285_s21] sm:$0xff]  ;;  %s630_s27 = sshll.u32 %s919_s18, 3  ;;  %s325_s12 = scalar_lea.vmem [#allocation9], %s1060_s9 }
  0x34   : > { %v327_v3 = vmul.f32 0.17677669, %v326_v1  ;;  %v331_v11 = vld [vmem:[%s285_s21 + $0x8] sm:$0xff]  ;;  %s444_s11 = scalar_lea.hbm %s1140_s4, %s630_s27  ;;  %s446_s6 = sshll.u32 %s325_s12, 4  ;;  %s447_s6 = int_to_ptr.vmem [resolvable:$true] %s446_s6 }
  0x35   : > { %404 = vmatpush.msra.mxu1 %v331_v11  ;;  %s448_s14 = sshll.u32 %s444_s11, 4  ;;  %s418_s13 = scalar_lea.sflag [#allocation10], %s1057_s7  ;;  %s449_s14 = int_to_ptr.hbm [resolvable:$true] %s448_s14 }
  0x36   : > { %s823_s18 = sshra.s32 %s449_s14, 4  ;;  %s829_s17 = scalar_lea.hbm %s1140_s4, 16  ;;  %s824_s18 = int_to_ptr.hbm [resolvable:$true] %s823_s18 }
  0x37   : > { %625 = vmatpush.xpose.msk.msra.mxu0 %vm332_vm0, %v328_v2  ;;  %405 = vmatpush.msra.mxu1 %v330_v12  ;;  %s825_s22 = scalar_lea.hbm %s824_s18, 8  ;;  %p830_p7 = scmp.lt.s32.totalorder %s824_s18, %s1140_s4 }
  0x38   : > { %p826_p4 = scmp.ne.s32.totalorder %s824_s18, %s825_s22  ;;  %p831_p8 = scmp.lt.s32.totalorder %s829_s17, %s825_s22 }
  0x3a   : > { %626 = vmatmul.msk.f32.vlgmr.msra.gmra.mxu0 %vm332_vm0, %v327_v3  ;;  %p827_p5 = pnand %p826_p4, %p1011_p9  ;;  %p832_p10 = por %p831_p8, %p830_p7 }
  0x3c   : > { %p828_p6 = pneg %p827_p5 }
  0x3e   : > { %p833_p13 = pnand %p832_p10, %p828_p6 }
  0xb7   : > { %v359_v4 = vpop.f32.mrf.mxu0 }
  0xb8   : > { %v363_v5 = vsel %vm362_vm1, %v359_v4, -inf }
  0xb9   : > { %364 = vmax.xlane.f32.xlu0 %v363_v5 }
 0x12c   : > { %v365_v6 = vpop.xlane.xlu0 %364 }
 0x12d   : > { %v366_v7 = vsub.f32 %v359_v4, %v365_v6 }
 0x12f   : > { %v367_v8 = vmul.f32 1.442695, %v366_v7 }
 0x131   : > { %715 = vpow2.f32 %v367_v8 }
 0x137   : > { %v716_v9 = vpop.eup %715 }
 0x138   : > { %v369_v10 = vsel %vm362_vm1, %v716_v9, 0.0 }
 0x139   : > { %370 = vadd.xlane.f32.xlu0 %v369_v10 }
 0x1ac   : > { %v371_v13 = vpop.xlane.xlu0 %370 }
 0x1ad   : > { %717 = vrcp.f32 %v371_v13  ;;  %v383_v17 = vand.u32 2147483648, %v371_v13  ;;  %v381_v19 = vand.u32 2147483647, %v371_v13  ;;  %vm377_vm3 = vweird.f32 %v371_v13 }
 0x1af   : > { %v384_v21 = vor.u32 1.1754944e-38, %v383_v17  ;;  %vm382_vm5 = vcmp.eq.f32.partialorder %v381_v19, 8.507059e+37 }
 0x1b3   : > { %v718_v14 = vpop.eup %717 }
 0x1b4   : > { %v373_v15 = vmul.f32 %v718_v14, %v371_v13  ;;  %vm378_vm2 = vweird.f32 %v718_v14 }
 0x1b5   : > { %vm379_vm4 = vmor %vm377_vm3, %vm378_vm2 }
 0x1b6   : > { %v374_v16 = vsub.f32 1.0, %v373_v15 }
 0x1b8   : > { %v375_v18 = vmul.f32 %v718_v14, %v374_v16 }
 0x1ba   : > { %v376_v20 = vadd.f32 %v718_v14, %v375_v18 }
 0x1bc   : > { %v380_v22 = vsel %vm379_vm4, %v718_v14, %v376_v20 }
 0x1bd   : > { %v385_v23 = vsel %vm382_vm5, %v384_v21, %v380_v22 }
 0x1be   : > { %v386_v24 = vmul.f32 %v716_v9, %v385_v23 }
 0x1c0   : > { %627 = vmatmul.msk.f32.vlgmr.msra.gmra.mxu1 %vm362_vm1, %v386_v24  ;;  %411 = vst.msk [vmem:[%s325_s12] sm:$0xff] %vm362_vm1, %v386_v24 }
 0x1c1   : > { %836 = shalt.err (!%p833_p13)
}
 0x1c2   : > { %643 = dma.vmem_to_hbm [thread:$0]  (%p1011_p9), %s447_s6, 128, %s449_s14, %s418_s13  }
 0x1c3   : > { %s429_s24 = scalar_lea.hbm %s1139_s3, %s630_s27  ;;  %s318_s25 = scalar_lea.vmem [#allocation8], %s1060_s9 }
 0x1c4   : > { %s431_s21 = sshll.u32 %s318_s25, 4  ;;  %s433_s26 = sshll.u32 %s429_s24, 4  ;;  %s432_s21 = int_to_ptr.vmem [resolvable:$true] %s431_s21  ;;  %s434_s26 = int_to_ptr.hbm [resolvable:$true] %s433_s26 }
 0x1c5   : > { %s413_s10 = scalar_lea.sflag [#allocation4], %s1057_s7  ;;  %s851_s11 = sshra.s32 %s434_s26, 4  ;;  %s852_s11 = int_to_ptr.hbm [resolvable:$true] %s851_s11 }
 0x1c6   : > { %s853_s12 = scalar_lea.hbm %s852_s11, 8  ;;  %s857_s27 = scalar_lea.hbm %s1139_s3, 16 }
 0x1c7   : > { %p854_p0 = scmp.ne.s32.totalorder %s852_s11, %s853_s12  ;;  %p858_p3 = scmp.lt.s32.totalorder %s852_s11, %s1139_s3 }
 0x1c8   : > { %p859_p4 = scmp.lt.s32.totalorder %s857_s27, %s853_s12 }
 0x1c9   : > { %p855_p1 = pnand %p854_p0, %p1011_p9 }
 0x1ca   : > { %p860_p5 = por %p859_p4, %p858_p3 }
 0x1cb   : > { %p856_p2 = pneg %p855_p1 }
 0x1cd   : > { %p861_p6 = pnand %p860_p5, %p856_p2 }
 0x23d   : > { %v407_v25 = vpop.f32.mrf.mxu1 }
 0x23e   : > { %410 = vst.msk [vmem:[%s318_s25] sm:$0xff] %vm332_vm0, %v407_v25 }
 0x23f   : > { %864 = shalt.err (!%p861_p6)
}
 0x240   : > { %642 = dma.vmem_to_hbm [thread:$0]  (%p1011_p9), %s432_s21, 128, %s434_s26, %s413_s10  }
 0x241 PF: > { %s460_s18 = sand.u32 1, %s907_s15   ;;  %p657_p7 = pnand %p609_p12, %p1018_p11 }
 0x242   : > { %s461_s22 = scalar_lea.sflag [#allocation4], %s460_s18 }
 0x243   : > { %p658_p8 = pneg %p657_p7 }
 0x245   : > { %898 = dma.done.wait (%p658_p8), %s461_s22, 128  }
 0x246   : > { %900 = vsyncadd (%p658_p8), %s461_s22, 4294967168  ;;  %s471_s23 = scalar_lea.sflag [#allocation10], %s460_s18 }
 0x247   : > { %902 = dma.done.wait (%p658_p8), %s471_s23, 128  }
 0x248   : > { %904 = vsyncadd (%p658_p8), %s471_s23, 4294967168  ;;  %s27_s20 = sadd.s32 1, %s927_s20   ;;  %s1156_s28 = sld [smem:[#allocation15_spill]] }
 0x249   : > { %p24_p10 = scmp.ge.s32.totalorder %s27_s20, 4   ;;  %s1157_s17 = sld [smem:[#allocation17_spill]] }
 0x24a   : > { %s1158_s29 = sld [smem:[#allocation16_spill]]  ;;  %s1159_s15 = smov %s911_s16 }
 0x24b   : > { %s1161_s18 = smov %s923_s19 }
 0x24c   :  { %26 = sbr.rel (!%p24_p10) target bundleno = 12 (0xc), region = 118 }
 0x24e   : > { %s1160_s16 = smov %s1156_s28 }
 0x250   : > { %s1162_s19 = smov %s1158_s29 }
 0x251   :  { %477 = vsyncpa [#allocation3], 1 }
 0x252   :  { %479 = vsyncpa [#allocation3 + $0x1], 1 }
 0x253   :  { %480 = vsyncpa [#allocation6], 1 }
 0x254   :  { %482 = vsyncpa [#allocation6 + $0x1], 1 }
 0x255   :  { %483 = vsyncpa [#allocation4], 1 }
 0x256   :  { %485 = vsyncpa [#allocation4 + $0x1], 1 }
 0x257   :  { %486 = vsyncpa [#allocation10], 1 }
 0x258   :  { %488 = vsyncpa [#allocation10 + $0x1], 1 }

</bundles_post_ra>
